<compile_context>
chip_gen: v7x
topology: tpu7x:2x2x1
jax: 0.10.0
libtpu: 0.0.40
codegen_flags: <defaults>
</compile_context>

<pallas_src>
import jax
import jax.numpy as jnp
from jax.experimental import pallas as pl
from jax.experimental.pallas import tpu as pltpu


# ---------------------------------------------------------------------------
# Pallas kernel: one grid step == one batch tile of Bt elements.
#   h_ref   : (Bt, S, H)  f32    hidden embeddings (cast to bf16 in-kernel)
#   sv_ref  : (Bt, S, 1)  f32    0.5 * (sub_heads + sub_tails)
#   w_ref   : (H, Np)     bf16   [W_sh | W_st | W_oh | W_ot | 0-pad]
#   b_ref   : (1, Np)     f32    [b_sh | b_st | b_oh | b_ot | 0-pad]
#   out_ref : (Bt, S, Np) bf16   fused sigmoid predictions (sliced in wrapper)
# ---------------------------------------------------------------------------
def casrel_head_kernel(h_ref, sv_ref, w_ref, b_ref, out_ref):
    bt, S, H = h_ref.shape
    n_pad = out_ref.shape[-1]

    w = w_ref[...]        # resident across grid steps (constant block index)
    bias = b_ref[...]     # (1, Np) f32

    # One large lane-dense MXU matmul covers all heads and the whole batch tile.
    h2d = h_ref[...].astype(jnp.bfloat16).reshape(bt * S, H)
    main = jnp.dot(h2d, w, preferred_element_type=jnp.float32)       # (Bt*S, Np)
    main = main.reshape(bt, S, n_pad)                                # (Bt, S, Np)

    # Subject-conditioned row per batch element, reusing `main`:
    #   (sv^T h) @ W == sv^T (h @ W)   -> VPU multiply + sublane (XLU) reduce.
    sv = sv_ref[...]                                                  # (Bt, S, 1)
    sub_add = jnp.sum(main * sv, axis=1, keepdims=True)               # (Bt, 1, Np)

    # Lanes 0,1 hold the subject-head/tail columns: they must NOT receive the
    # subject-conditioned addition.  Padded lanes have zero W (sub_add == 0).
    lane = jax.lax.broadcasted_iota(jnp.int32, (1, n_pad), 1)
    obj_mask = lane >= 2
    row = jnp.where(obj_mask, sub_add, 0.0) + bias                    # (Bt, 1, Np)

    out_ref[...] = jax.nn.sigmoid(main + row).astype(out_ref.dtype)   # (Bt, S, Np)


def _vmem_plan():
    """Generation-aware VMEM budget for tile picking + compiler scoped limit."""
    try:
        cap = pltpu.get_tpu_info().vmem_capacity_bytes
    except Exception:
        cap = 64 << 20                        # assume the smallest (v7x per-core)
    budget = min(cap // 2, 48 << 20)          # 48 MiB on v5e/v6e, 32 MiB on v7x
    limit = int(min((cap * 3) // 4, 100 << 20))  # 96 MiB on v5e/v6e, 48 MiB on v7x
    return budget, limit


def _pick_block_b(B, S, H, n_pad, budget_bytes):
    """Largest divisor of B fitting the VMEM budget, preferring >= 4 grid steps
    (>= 2 per TensorCore on v7x), then >= 2, trading Bt down only as needed."""
    per_b = (2 * (S * H * 4)           # f32 hidden tile, double-buffered
             + 2 * (S * 4)             # sv tile, double-buffered
             + 2 * (S * n_pad * 2)     # bf16 output tile, double-buffered
             + S * H * 2               # in-kernel bf16 copy of h
             + S * n_pad * 4)          # in-kernel f32 `main` intermediate
    fixed = 2 * (H * n_pad * 2 + n_pad * 4)   # (double-buffered) weights + bias
    max_bt = max(1, (budget_bytes - fixed) // max(per_b, 1))
    divisors = [d for d in range(1, B + 1) if B % d == 0 and d <= max_bt]
    if not divisors:
        # TODO(synk): pad B in the wrapper when B is prime and > max_bt instead
        # of falling back to many tiny grid steps.
        return 1
    for min_steps in (4, 2, 1):
        cands = [d for d in divisors if B // d >= min_steps]
        if cands:
            return max(cands)
    return 1


def casrel_forward(hidden_emb, sub_heads, sub_tails, params, block_b=None):
    """Pallas-call wrapper. hidden_emb: (B,S,H) f32; sub_heads/sub_tails: (B,S).
    Best used under jax.jit so the output-slab slices fuse with consumers."""
    B, S, H = hidden_emb.shape
    R = params["w_oh"].shape[1]
    n_out = 2 + 2 * R
    n_pad = pl.cdiv(n_out, 128) * 128          # lane-dense output width

    budget, vmem_limit = _vmem_plan()
    if block_b is None:
        block_b = _pick_block_b(B, S, H, n_pad, budget)
    assert B % block_b == 0

    # ---- fused weight / bias packing (wrapper-side layout plumbing, tiny) ----
    w_fused = jnp.zeros((H, n_pad), jnp.float32)
    w_fused = w_fused.at[:, 0:1].set(params["w_sh"])
    w_fused = w_fused.at[:, 1:2].set(params["w_st"])
    w_fused = w_fused.at[:, 2:2 + R].set(params["w_oh"])
    w_fused = w_fused.at[:, 2 + R:2 + 2 * R].set(params["w_ot"])
    w_fused = w_fused.astype(jnp.bfloat16)

    b_fused = jnp.zeros((1, n_pad), jnp.float32)
    b_fused = b_fused.at[:, 0:1].set(params["b_sh"].reshape(1, 1))
    b_fused = b_fused.at[:, 1:2].set(params["b_st"].reshape(1, 1))
    b_fused = b_fused.at[:, 2:2 + R].set(params["b_oh"].reshape(1, R))
    b_fused = b_fused.at[:, 2 + R:2 + 2 * R].set(params["b_ot"].reshape(1, R))

    # Feed hidden_emb as f32 (no standalone HBM cast pass); combined subject vec.
    h_f32 = hidden_emb.astype(jnp.float32)
    sv = (0.5 * (sub_heads + sub_tails)).astype(jnp.float32).reshape(B, S, 1)

    cost = pl.CostEstimate(
        flops=2 * B * S * H * n_pad + 3 * B * S * n_pad,
        transcendentals=B * S * n_pad,
        bytes_accessed=(B * S * H * 4 + B * S * 4 + H * n_pad * 2
                        + n_pad * 4 + B * S * n_pad * 2),
    )

    out = pl.pallas_call(
        casrel_head_kernel,
        out_shape=jax.ShapeDtypeStruct((B, S, n_pad), jnp.bfloat16),
        grid=(B // block_b,),
        in_specs=[
            pl.BlockSpec((block_b, S, H), lambda i: (i, 0, 0)),   # hidden_emb f32
            pl.BlockSpec((block_b, S, 1), lambda i: (i, 0, 0)),   # sv = 0.5*(sh+st)
            pl.BlockSpec((H, n_pad), lambda i: (0, 0)),           # fused weight
            pl.BlockSpec((1, n_pad), lambda i: (0, 0)),           # fused bias row
        ],
        out_specs=pl.BlockSpec((block_b, S, n_pad), lambda i: (i, 0, 0)),
        compiler_params=pltpu.CompilerParams(
            dimension_semantics=("parallel",),
            vmem_limit_bytes=vmem_limit,
        ),
        cost_estimate=cost,
    )(h_f32, sv, w_fused, b_fused)

    # Slice the lane-dense slab back into the four module outputs (fuses under jit).
    shp = out[..., 0:1]
    stp = out[..., 1:2]
    ohp = out[..., 2:2 + R]
    otp = out[..., 2 + R:2 + 2 * R]
    return shp, stp, ohp, otp


def casrel_forward_ref(hidden_emb, sub_heads, sub_tails, params):
    """Pure-JAX f32 reference mirroring the PyTorch forward (post-encoder)."""
    shp = jax.nn.sigmoid(hidden_emb @ params["w_sh"] + params["b_sh"])
    stp = jax.nn.sigmoid(hidden_emb @ params["w_st"] + params["b_st"])
    sub_heads_mm = jnp.einsum("bs,bsh->bh", sub_heads, hidden_emb)[:, None, :]
    sub_tails_mm = jnp.einsum("bs,bsh->bh", sub_tails, hidden_emb)[:, None, :]
    sub_both = (sub_heads_mm + sub_tails_mm) / 2.0
    h_sub = sub_both + hidden_emb
    ohp = jax.nn.sigmoid(h_sub @ params["w_oh"] + params["b_oh"])
    otp = jax.nn.sigmoid(h_sub @ params["w_ot"] + params["b_ot"])
    return shp, stp, ohp, otp


if __name__ == "__main__":
    # small shapes consistent with the module's forward
    B, S, H, R, VOCAB = 2, 8, 32, 4, 50   # batch, seq, bert_dim, num_rel, vocab

    key = jax.random.PRNGKey(0)
    k_tok, k_emb, k_sh, k_st, k_p = jax.random.split(key, 5)
    kw = jax.random.split(k_p, 8)

    # ---- synthetic "BERT" encoder (plain-JAX glue) ----
    # TODO(synk): real BertModel has no clean Pallas equivalent here; replaced
    # by a deterministic embedding lookup * attention mask.
    token_ids = jax.random.randint(k_tok, (B, S), 0, VOCAB)
    masks = jnp.ones((B, S), dtype=jnp.float32)
    emb_table = jax.random.normal(k_emb, (VOCAB, H), dtype=jnp.float32) * 0.1
    hidden_emb = emb_table[token_ids] * masks[..., None]          # (B, S, H)

    # subject head/tail soft indicators (as supplied in `data`)
    sub_heads = jax.random.uniform(k_sh, (B, S), dtype=jnp.float32)
    sub_tails = jax.random.uniform(k_st, (B, S), dtype=jnp.float32)

    # linear-head parameters stored as (in, out) / (1, out)
    params = {
        "w_sh": jax.random.normal(kw[0], (H, 1), dtype=jnp.float32) * 0.05,
        "b_sh": jax.random.normal(kw[1], (1, 1), dtype=jnp.float32) * 0.05,
        "w_st": jax.random.normal(kw[2], (H, 1), dtype=jnp.float32) * 0.05,
        "b_st": jax.random.normal(kw[3], (1, 1), dtype=jnp.float32) * 0.05,
        "w_oh": jax.random.normal(kw[4], (H, R), dtype=jnp.float32) * 0.05,
        "b_oh": jax.random.normal(kw[5], (1, R), dtype=jnp.float32) * 0.05,
        "w_ot": jax.random.normal(kw[6], (H, R), dtype=jnp.float32) * 0.05,
        "b_ot": jax.random.normal(kw[7], (1, R), dtype=jnp.float32) * 0.05,
    }

    fwd = jax.jit(casrel_forward)
    outs = fwd(hidden_emb, sub_heads, sub_tails, params)
    outs = jax.block_until_ready(outs)

    refs = casrel_forward_ref(hidden_emb, sub_heads, sub_tails, params)
    # bf16 matmul operands + bf16 output + algebraic refactor -> loosened tolerance
    for o, r in zip(outs, refs):
        assert o.shape == r.shape, (o.shape, r.shape)
        assert jnp.allclose(o.astype(jnp.float32), r, atol=2e-2, rtol=2e-2), \
            float(jnp.max(jnp.abs(o.astype(jnp.float32) - r)))

    print("KERNEL_OK")
</pallas_src>

<mosaic_0001>
module attributes {stable_mosaic.version = 11 : i64} {
  func.func @casrel_head_kernel(%arg0: i32, %arg1: memref<1x8x32xf32, #tpu.memory_space<vmem>>, %arg2: memref<1x8x1xf32, #tpu.memory_space<vmem>>, %arg3: memref<32x128xbf16, #tpu.memory_space<vmem>>, %arg4: memref<1x128xf32, #tpu.memory_space<vmem>>, %arg5: memref<1x8x128xbf16, #tpu.memory_space<vmem>>) attributes {dimension_semantics = [#tpu.dimension_semantics<parallel>], iteration_bounds = array<i64: 2>, scalar_prefetch = 0 : i64, scratch_operands = 0 : i64, tpu.core_type = #tpu.core_type<tc>, window_params = [{transform_indices = @transform_0, window_bounds = array<i64: 1, 8, 32>}, {transform_indices = @transform_1, window_bounds = array<i64: 1, 8, 1>}, {pipeline_mode = #tpu.pipeline_mode<synchronous>, transform_indices = @transform_2, window_bounds = array<i64: 32, 128>}, {pipeline_mode = #tpu.pipeline_mode<synchronous>, transform_indices = @transform_3, window_bounds = array<i64: 1, 128>}, {transform_indices = @transform_4, window_bounds = array<i64: 1, 8, 128>}]} {
    %c0 = arith.constant 0 : index
    %c0_0 = arith.constant 0 : index
    %0 = vector.load %arg3[%c0, %c0_0] : memref<32x128xbf16, #tpu.memory_space<vmem>>, vector<32x128xbf16>
    %c0_1 = arith.constant 0 : index
    %c0_2 = arith.constant 0 : index
    %1 = vector.load %arg4[%c0_1, %c0_2] : memref<1x128xf32, #tpu.memory_space<vmem>>, vector<1x128xf32>
    %c0_3 = arith.constant 0 : index
    %c0_4 = arith.constant 0 : index
    %c0_5 = arith.constant 0 : index
    %2 = vector.load %arg1[%c0_3, %c0_4, %c0_5] : memref<1x8x32xf32, #tpu.memory_space<vmem>>, vector<1x8x32xf32>
    %3 = arith.truncf %2 : vector<1x8x32xf32> to vector<1x8x32xbf16>
    %4 = vector.shape_cast %3 : vector<1x8x32xbf16> to vector<8x32xbf16>
    %cst = arith.constant dense<0.000000e+00> : vector<8x128xf32>
    %5 = tpu.matmul %4, %0, %cst {dimension_numbers = #tpu.dot_dimension_numbers<[1], [0], [0], [1], [0, 0, 1, 1], [], []>} : vector<8x32xbf16>, vector<32x128xbf16>, vector<8x128xf32> -> vector<8x128xf32>
    %6 = vector.shape_cast %5 : vector<8x128xf32> to vector<1x8x128xf32>
    %c0_6 = arith.constant 0 : index
    %c0_7 = arith.constant 0 : index
    %c0_8 = arith.constant 0 : index
    %7 = vector.load %arg2[%c0_6, %c0_7, %c0_8] : memref<1x8x1xf32, #tpu.memory_space<vmem>>, vector<1x8x1xf32>
    %8 = vector.broadcast %7 : vector<1x8x1xf32> to vector<1x8x128xf32>
    %9 = arith.mulf %6, %8 : vector<1x8x128xf32>
    %cst_9 = arith.constant dense<0.000000e+00> : vector<1x128xf32>
    %10 = vector.multi_reduction <add>, %9, %cst_9 [1] : vector<1x8x128xf32> to vector<1x128xf32>
    %11 = vector.shape_cast %10 : vector<1x128xf32> to vector<1x1x128xf32>
    %12 = tpu.iota {dimensions = array<i32: 1>} : vector<1x128xi32>
    %c2_i32 = arith.constant 2 : i32
    %13 = vector.broadcast %c2_i32 : i32 to vector<1x128xi32>
    %14 = arith.cmpi sge, %12, %13 : vector<1x128xi32>
    %cst_10 = arith.constant 0.000000e+00 : f32
    %15 = vector.shape_cast %14 : vector<1x128xi1> to vector<1x1x128xi1>
    %16 = vector.broadcast %cst_10 : f32 to vector<1x1x128xf32>
    %17 = arith.select %15, %11, %16 : vector<1x1x128xi1>, vector<1x1x128xf32>
    %18 = vector.shape_cast %1 : vector<1x128xf32> to vector<1x1x128xf32>
    %19 = arith.addf %17, %18 : vector<1x1x128xf32>
    %20 = vector.broadcast %19 : vector<1x1x128xf32> to vector<1x8x128xf32>
    %21 = arith.addf %6, %20 : vector<1x8x128xf32>
    %22 = arith.negf %21 : vector<1x8x128xf32>
    %23 = math.exp %22 : vector<1x8x128xf32>
    %cst_11 = arith.constant 1.000000e+00 : f32
    %24 = vector.broadcast %cst_11 : f32 to vector<1x8x128xf32>
    %25 = arith.addf %24, %23 : vector<1x8x128xf32>
    %26 = arith.divf %24, %25 : vector<1x8x128xf32>
    %27 = arith.truncf %26 : vector<1x8x128xf32> to vector<1x8x128xbf16>
    %c0_12 = arith.constant 0 : index
    %c0_13 = arith.constant 0 : index
    %c0_14 = arith.constant 0 : index
    %28 = vector.load %arg5[%c0_12, %c0_13, %c0_14] : memref<1x8x128xbf16, #tpu.memory_space<vmem>>, vector<1x8x128xbf16>
    tpu.vector_store %arg5[%c0_12, %c0_13, %c0_14], %27 {strides = array<i32>} : memref<1x8x128xbf16, #tpu.memory_space<vmem>>, vector<1x8x128xbf16>,
    return
  }
  func.func @transform_0(%arg0: i32) -> (i32, i32, i32) {
    %c0_i32 = arith.constant 0 : i32
    %c0_i32_0 = arith.constant 0 : i32
    %c0_i32_1 = arith.constant 0 : i32
    return %arg0, %c0_i32, %c0_i32_0 : i32, i32, i32
  }
  func.func @transform_1(%arg0: i32) -> (i32, i32, i32) {
    %c0_i32 = arith.constant 0 : i32
    %c0_i32_0 = arith.constant 0 : i32
    %c0_i32_1 = arith.constant 0 : i32
    return %arg0, %c0_i32, %c0_i32_0 : i32, i32, i32
  }
  func.func @transform_2(%arg0: i32) -> (i32, i32) {
    %c0_i32 = arith.constant 0 : i32
    %c0_i32_0 = arith.constant 0 : i32
    %c0_i32_1 = arith.constant 0 : i32
    return %c0_i32, %c0_i32_0 : i32, i32
  }
  func.func @transform_3(%arg0: i32) -> (i32, i32) {
    %c0_i32 = arith.constant 0 : i32
    %c0_i32_0 = arith.constant 0 : i32
    %c0_i32_1 = arith.constant 0 : i32
    return %c0_i32, %c0_i32_0 : i32, i32
  }
  func.func @transform_4(%arg0: i32) -> (i32, i32, i32) {
    %c0_i32 = arith.constant 0 : i32
    %c0_i32_0 = arith.constant 0 : i32
    %c0_i32_1 = arith.constant 0 : i32
    return %arg0, %c0_i32, %c0_i32_0 : i32, i32, i32
  }
}

</mosaic_0001>

<bundles_post_ra>
// kernel: casrel_forward.1
= control target key start
LH: loop header
LB: loop body
LE: loop exit
PB: predicated region body
PF: predicated region fallthrough
CT: control target
= control target key end

     0   :  { %s449_s15 = smov 0   ;;  %s482_s0 = inlined_call_operand.vmem [shape: f32[2,8,32], index: 0, kind: input, shape index: {}]   ;;  %s483_s1 = inlined_call_operand.vmem [shape: f32[2,8,1], index: 1, kind: input, shape index: {}]   ;;  %s484_s2 = inlined_call_operand.vmem [shape: bf16[32,128], index: 2, kind: input, shape index: {}]   ;;  %s485_s3 = inlined_call_operand.vmem [shape: f32[1,128], index: 3, kind: input, shape index: {}]   ;;  %s486_s4 = inlined_call_operand.vmem [shape: bf16[2,8,128], index: 4, kind: output, shape index: {}]  }
   0x1 LB: > { %s370_s16 = sadd.s32 4294967295, %s419_s15   ;;  %p374_p0 = scmp.ge.s32.totalorder %s419_s15, 1  ;;  %s419_s15 = sphi %s449_s15, %s14_s15  }
   0x2   : > { %p170_p1 = scmp.lt.s32.totalorder %s419_s15, 3 }
   0x4   : > { %p171_p2 = pnand %p374_p0, %p170_p1 }
   0x5   : > { %v407_v0 = vld [vmem:[%s484_s2] sm:$0xff] (!%p171_p2)   ;;  %v421_v1 = vmov (!%p171_p2), 0.0   ;;  %v408_v2 = vld [vmem:[%s484_s2 + $0x8] sm:$0xff] (!%p171_p2)   ;;  %vm422_vm0 = vmmov (!%p171_p2), 0   ;;  %p198_p3 = scmp.lt.s32.totalorder (!%p171_p2), %s370_s16, 1  ;;  %v423_v3 = vmov (!%p171_p2), 0   ;;  %v287_v14 = vlaneseq (!%p171_p2) }
   0x6   : > { %174 = sbr.rel (%p171_p2) target bundleno = 281 (0x119), region = 36  ;;  %387 = vmatprep.subr.bf16.mxu0 (!%p171_p2), %v421_v1  ;;  %391 = vmatprep.mubr.msk.bf16.mxu0 (!%p171_p2), %vm422_vm0, %v421_v1  ;;  %vm230_vm1 = vcmask (!%p171_p2), 261120   ;;  %v215_v21 = vld [vmem:[%s485_s3] sm:$0x1] (!%p171_p2) }
   0x7   : > { %388 = vmatpush3.bf16.msra.mxu0 (!%p171_p2), %v407_v0  ;;  %406 = vset.pattern.permute.xlu0 (!%p171_p2), %v423_v3  ;;  %v288_v17 = vand.u32 (!%p171_p2), 127, %v287_v14  ;;  %v293_v19 = vshrl.u32 (!%p171_p2), %v287_v14, 7 }
   0x8   : > { %389 = vmatprep.subr.bf16.mxu0 (!%p171_p2), %v421_v1 }
   0x9   : > { %vm289_vm2 = vcmp.ge.s32.totalorder (!%p171_p2), %v288_v17, 2  ;;  %v294_v23 = vsub.s32 (!%p171_p2), 0, %v293_v19 }
   0xb   : > { %390 = vmatpush3.bf16.msra.mxu0 (!%p171_p2), %v408_v2 }
   0xd   : > { %s488_s16 = smov (!%p198_p3, %s370_s16), 1 }
   0xe   : > { %s375_s21 = sshll.u32 %s488_s16, 3  ;;  %s377_s30 = sshll.u32 %s488_s16, 2 }
   0xf   : > { %s201_s24 = scalar_lea.vmem %s482_s0, %s375_s21  ;;  %s205_s27 = scalar_lea.vmem %s483_s1, %s375_s21 }
  0x10   : > { %v216_v4 = vld [vmem:[%s201_s24] sm:$0xff]  ;;  %s209_s7 = scalar_lea.vmem %s486_s4, %s377_s30 }
  0x11   : > { %v274_v5 = vld [vmem:[%s205_s27] sm:$0xff]  ;;  %v217_v6 = vpack.c.bf16 %v216_v4, %v216_v4 }
  0x12   : > { %277 = vperm.xlu0 %406, %v274_v5  }
  0x13   : > { %392 = vmatmul.mubr.msk.bf16.vlgmr.msra.gmra.mrb[0].mxu0 %vm230_vm1, %v217_v6 }
  0x91   : > { %v278_v7 = vpop.permute.xlu0 %277 }
  0xe6   : > { %v268_v8 = vpop.f32.mrb[0].mxu0 }
  0xe7   : > { %v280_v9 = vmul.f32 %v278_v7, %v268_v8  ;;  %v393_v10 = vpop.f32.mrb[1].mxu0 }
  0xe8   : > { %v271_v11 = vpop.f32.mrb[2].mxu0 }
  0xe9   : > { %v281_v12 = vrot.slane %v280_v9, 4  ;;  %v394_v13 = vpop.f32.mrb[3].mxu0 }
  0xeb   : > { %v282_v15 = vadd.f32 %v281_v12, %v280_v9 }
  0xed   : > { %v283_v16 = vrot.slane %v282_v15, 2 }
  0xef   : > { %v284_v18 = vadd.f32 %v283_v16, %v282_v15 }
  0xf1   : > { %v285_v20 = vrot.slane %v284_v18, 1 }
  0xf3   : > { %v286_v22 = vadd.f32 %v285_v20, %v284_v18 }
  0xf5   : > { %v290_v24 = vsel %vm289_vm2, %v286_v22, 0.0 }
  0xf6   : > { %v291_v25 = vadd.f32 %v290_v24, %v215_v21 }
  0xf8   : > { %v295_v26 = vrot.slane %v291_v25, %v294_v23 }
  0xfa   : > { %v296_v27 = vadd.f32 %v295_v26, %v268_v8 }
  0xfc   : > { %v381_v28 = vmul.f32 -1.442695, %v296_v27 }
  0xfe   : > { %409 = vpow2.f32 %v381_v28 }
 0x108   : > { %v410_v29 = vpop.eup %409 }
 0x109   : > { %v300_v30 = vadd.f32 1.0, %v410_v29 }
 0x10b   : > { %411 = vrcp.f32 %v300_v30 }
 0x115   : > { %v412_v31 = vpop.eup %411 }
 0x116   : > { %v303_v32 = vpack.c.bf16 %v412_v31, %v412_v31 }
 0x118   : > { %304 = vst [vmem:[%s209_s7] sm:$0xf] %v303_v32 }
 0x119 PF: > { %s14_s15 = sadd.s32 1, %s419_s15  }
 0x11a   : > { %p11_p4 = scmp.ge.s32.totalorder %s14_s15, 4  }
 0x11c   :  { %13 = sbr.rel (!%p11_p4) target bundleno = 1 (0x1), region = 69 }

</bundles_post_ra>
